<compile_context>
chip_gen: v5e
topology: v5e:2x2
jax: 0.10.0
libtpu: 0.0.40
codegen_flags: <defaults>
</compile_context>

<pallas_src>
import jax
import jax.numpy as jnp
from jax.experimental import pallas as pl
from jax.experimental.pallas import tpu as pltpu

NUM_UNITS = 10
IN_FEATURES = 29
HIDDEN2 = 10
OUT_FEATURES = 2

# Columns (batch rows) per grid step. In the feature-major layout the x block
# is (29->32 sublanes, tile_b lanes) f32 ~= 1 MiB at 8192, x2 for double
# buffering: comfortably inside the scoped-VMEM default on v5e/v6e/v7x.
DEFAULT_TILE_B = 8192


def _mlp_kernel(xt_ref, w0_ref, b0_ref, w1_ref, b1_ref, wd_ref, bd_ref, o_ref):
    xt = xt_ref[...]                                              # (29, tile_b)

    # dense0 + relu (feature-major):  h0 = W0 @ x^T + b0  -> (10, tile_b)
    h0 = jnp.dot(w0_ref[...], xt, preferred_element_type=jnp.float32) + b0_ref[...]
    h0 = jnp.maximum(h0, 0.0)

    # dropout -> identity (eval / inference mode)

    # dense1 + relu:  h1 = W1 @ h0 + b1  -> (10, tile_b)
    h1 = jnp.dot(w1_ref[...], h0, preferred_element_type=jnp.float32) + b1_ref[...]
    h1 = jnp.maximum(h1, 0.0)

    # 2-class head folded to a single logit-difference row:
    #   d = (w2[1]-w2[0]) @ h1 + (b2[1]-b2[0])  -> (1, tile_b)
    #   p1 = sigmoid(d), p0 = 1 - p1   (exactly softmax over 2 classes)
    d = jnp.dot(wd_ref[...], h1, preferred_element_type=jnp.float32) + bd_ref[...]
    p1 = jax.nn.sigmoid(d)                                        # (1, tile_b)

    # Lane-dense (2, tile_b) store: row 0 = p0, row 1 = p1.
    row = jax.lax.broadcasted_iota(jnp.int32, o_ref.shape, dimension=0)
    o_ref[...] = jnp.where(row == 1, p1, 1.0 - p1)


def _round_up(n, m):
    return ((n + m - 1) // m) * m


def _prep_kernel_params(params):
    """PyTorch-native params -> kernel layout (weights (out,in), biases (out,1),
    2-class head folded to a logit-difference row)."""
    w0 = params["w0"]                       # (10, 29)
    b0 = params["b0"].reshape(NUM_UNITS, 1)  # (10, 1)
    w1 = params["w1"]                       # (10, 10)
    b1 = params["b1"].reshape(HIDDEN2, 1)   # (10, 1)
    w2, b2 = params["w2"], params["b2"]     # (2, 10), (2,)
    wd = (w2[1, :] - w2[0, :]).reshape(1, HIDDEN2)   # (1, 10)
    bd = (b2[1] - b2[0]).reshape(1, 1)               # (1, 1)
    return w0, b0, w1, b1, wd, bd


def classifier_forward(x, params, tile_b=DEFAULT_TILE_B, core_parallel=False):
    """x: (B, 29) float32.  params: PyTorch-native (out,in) weights, (out,) biases.

    Returns (B, 2) softmax probabilities.
    """
    B = x.shape[0]

    # Tile: multiple of 128 (lane alignment), no larger than the padded batch.
    tile_b = max(128, min(_round_up(tile_b, 128), _round_up(B, 128)))
    n_tiles = pl.cdiv(B, tile_b)
    Bp = n_tiles * tile_b

    # Feature-major input: (29, Bp). Zero-padded columns are sliced off below.
    xt = x.T
    if Bp != B:
        xt = jnp.pad(xt, ((0, 0), (0, Bp - B)))

    weights = _prep_kernel_params(params)

    def resident(a):
        # Full-array block + constant block index => DMA'd once, VMEM-resident.
        return pl.BlockSpec(a.shape, lambda i: (0,) * a.ndim)

    flops = 2 * Bp * (IN_FEATURES * NUM_UNITS + NUM_UNITS * HIDDEN2 + HIDDEN2)
    bytes_accessed = (Bp * (IN_FEATURES + OUT_FEATURES) * 4
                      + sum(int(a.size) * 4 for a in weights))
    cost = pl.CostEstimate(flops=flops, transcendentals=Bp,
                           bytes_accessed=bytes_accessed)

    # "parallel" is a safe default everywhere; CORE_PARALLEL shards the batch
    # grid axis across the two TensorCores on v7x.
    semantics = (pltpu.CORE_PARALLEL,) if core_parallel else ("parallel",)

    out = pl.pallas_call(
        _mlp_kernel,
        out_shape=jax.ShapeDtypeStruct((OUT_FEATURES, Bp), jnp.float32),
        grid=(n_tiles,),
        in_specs=[
            pl.BlockSpec((IN_FEATURES, tile_b), lambda i: (0, i)),
            resident(weights[0]), resident(weights[1]),
            resident(weights[2]), resident(weights[3]),
            resident(weights[4]), resident(weights[5]),
        ],
        out_specs=pl.BlockSpec((OUT_FEATURES, tile_b), lambda i: (0, i)),
        compiler_params=pltpu.CompilerParams(dimension_semantics=semantics),
        cost_estimate=cost,
    )(xt, *weights)

    return out[:, :B].T                      # (B, 2)


def init_params(key):
    """Deterministic init matching PyTorch Linear shapes: weight (out, in),
    bias (out,), Kaiming-uniform-like bounds."""
    def linear(k, fan_in, fan_out):
        kw, kb = jax.random.split(k)
        bound = 1.0 / jnp.sqrt(jnp.float32(fan_in))
        w = jax.random.uniform(kw, (fan_out, fan_in), jnp.float32, -bound, bound)
        b = jax.random.uniform(kb, (fan_out,), jnp.float32, -bound, bound)
        return w, b

    k0, k1, k2 = jax.random.split(key, 3)
    w0, b0 = linear(k0, IN_FEATURES, NUM_UNITS)
    w1, b1 = linear(k1, NUM_UNITS, HIDDEN2)
    w2, b2 = linear(k2, HIDDEN2, OUT_FEATURES)
    return {"w0": w0, "b0": b0, "w1": w1, "b1": b1, "w2": w2, "b2": b2}


def reference_forward(x, p):
    h0 = jnp.maximum(x @ p["w0"].T + p["b0"], 0.0)
    h1 = jnp.maximum(h0 @ p["w1"].T + p["b1"], 0.0)
    return jax.nn.softmax(h1 @ p["w2"].T + p["b2"], axis=-1)


if __name__ == "__main__":
    key = jax.random.PRNGKey(0)
    kx, kp = jax.random.split(key)
    params = init_params(kp)

    # Small case: single tile (clamped to 128 columns).
    B = 8
    x = jax.random.normal(kx, (B, IN_FEATURES), dtype=jnp.float32)
    out = jax.block_until_ready(classifier_forward(x, params))
    ref = reference_forward(x, params)
    assert out.shape == (B, OUT_FEATURES)
    assert jnp.allclose(out, ref, atol=1e-5, rtol=1e-5)
    assert jnp.allclose(jnp.sum(out, axis=-1), 1.0, atol=1e-5)

    # Multi-tile + ragged batch: exercises the grid, resident weights, padding.
    B2 = 300
    x2 = jax.random.normal(jax.random.PRNGKey(1), (B2, IN_FEATURES), dtype=jnp.float32)
    out2 = jax.block_until_ready(classifier_forward(x2, params, tile_b=128))
    ref2 = reference_forward(x2, params)
    assert out2.shape == (B2, OUT_FEATURES)
    assert jnp.allclose(out2, ref2, atol=1e-5, rtol=1e-5)
    assert jnp.allclose(jnp.sum(out2, axis=-1), 1.0, atol=1e-5)

    print("KERNEL_OK")
</pallas_src>

<mosaic_0001>
module attributes {stable_mosaic.version = 11 : i64} {
  func.func @_mlp_kernel(%arg0: i32, %arg1: memref<29x128xf32, #tpu.memory_space<vmem>>, %arg2: memref<10x29xf32, #tpu.memory_space<vmem>>, %arg3: memref<10x1xf32, #tpu.memory_space<vmem>>, %arg4: memref<10x10xf32, #tpu.memory_space<vmem>>, %arg5: memref<10x1xf32, #tpu.memory_space<vmem>>, %arg6: memref<1x10xf32, #tpu.memory_space<vmem>>, %arg7: memref<1x1xf32, #tpu.memory_space<vmem>>, %arg8: memref<2x128xf32, #tpu.memory_space<vmem>>) attributes {dimension_semantics = [#tpu.dimension_semantics<parallel>], iteration_bounds = array<i64: 1>, scalar_prefetch = 0 : i64, scratch_operands = 0 : i64, tpu.core_type = #tpu.core_type<tc>, window_params = [{transform_indices = @transform_0, window_bounds = array<i64: 29, 128>}, {pipeline_mode = #tpu.pipeline_mode<synchronous>, transform_indices = @transform_1, window_bounds = array<i64: 10, 29>}, {pipeline_mode = #tpu.pipeline_mode<synchronous>, transform_indices = @transform_2, window_bounds = array<i64: 10, 1>}, {pipeline_mode = #tpu.pipeline_mode<synchronous>, transform_indices = @transform_3, window_bounds = array<i64: 10, 10>}, {pipeline_mode = #tpu.pipeline_mode<synchronous>, transform_indices = @transform_4, window_bounds = array<i64: 10, 1>}, {pipeline_mode = #tpu.pipeline_mode<synchronous>, transform_indices = @transform_5, window_bounds = array<i64: 1, 10>}, {pipeline_mode = #tpu.pipeline_mode<synchronous>, transform_indices = @transform_6, window_bounds = array<i64: 1, 1>}, {transform_indices = @transform_7, window_bounds = array<i64: 2, 128>}]} {
    %c0 = arith.constant 0 : index
    %c0_0 = arith.constant 0 : index
    %0 = vector.load %arg1[%c0, %c0_0] : memref<29x128xf32, #tpu.memory_space<vmem>>, vector<29x128xf32>
    %c0_1 = arith.constant 0 : index
    %c0_2 = arith.constant 0 : index
    %1 = vector.load %arg2[%c0_1, %c0_2] : memref<10x29xf32, #tpu.memory_space<vmem>>, vector<10x29xf32>
    %cst = arith.constant dense<0.000000e+00> : vector<10x128xf32>
    %2 = tpu.matmul %1, %0, %cst {dimension_numbers = #tpu.dot_dimension_numbers<[1], [0], [0], [1], [0, 0, 1, 1], [], []>} : vector<10x29xf32>, vector<29x128xf32>, vector<10x128xf32> -> vector<10x128xf32>
    %c0_3 = arith.constant 0 : index
    %c0_4 = arith.constant 0 : index
    %3 = vector.load %arg3[%c0_3, %c0_4] : memref<10x1xf32, #tpu.memory_space<vmem>>, vector<10x1xf32>
    %4 = vector.broadcast %3 : vector<10x1xf32> to vector<10x128xf32>
    %5 = arith.addf %2, %4 : vector<10x128xf32>
    %cst_5 = arith.constant 0.000000e+00 : f32
    %6 = vector.broadcast %cst_5 : f32 to vector<10x128xf32>
    %7 = arith.maximumf %5, %6 : vector<10x128xf32>
    %c0_6 = arith.constant 0 : index
    %c0_7 = arith.constant 0 : index
    %8 = vector.load %arg4[%c0_6, %c0_7] : memref<10x10xf32, #tpu.memory_space<vmem>>, vector<10x10xf32>
    %cst_8 = arith.constant dense<0.000000e+00> : vector<10x128xf32>
    %9 = tpu.matmul %8, %7, %cst_8 {dimension_numbers = #tpu.dot_dimension_numbers<[1], [0], [0], [1], [0, 0, 1, 1], [], []>} : vector<10x10xf32>, vector<10x128xf32>, vector<10x128xf32> -> vector<10x128xf32>
    %c0_9 = arith.constant 0 : index
    %c0_10 = arith.constant 0 : index
    %10 = vector.load %arg5[%c0_9, %c0_10] : memref<10x1xf32, #tpu.memory_space<vmem>>, vector<10x1xf32>
    %11 = vector.broadcast %10 : vector<10x1xf32> to vector<10x128xf32>
    %12 = arith.addf %9, %11 : vector<10x128xf32>
    %cst_11 = arith.constant 0.000000e+00 : f32
    %13 = vector.broadcast %cst_11 : f32 to vector<10x128xf32>
    %14 = arith.maximumf %12, %13 : vector<10x128xf32>
    %c0_12 = arith.constant 0 : index
    %c0_13 = arith.constant 0 : index
    %15 = vector.load %arg6[%c0_12, %c0_13] : memref<1x10xf32, #tpu.memory_space<vmem>>, vector<1x10xf32>
    %cst_14 = arith.constant dense<0.000000e+00> : vector<1x128xf32>
    %16 = tpu.matmul %15, %14, %cst_14 {dimension_numbers = #tpu.dot_dimension_numbers<[1], [0], [0], [1], [0, 0, 1, 1], [], []>} : vector<1x10xf32>, vector<10x128xf32>, vector<1x128xf32> -> vector<1x128xf32>
    %c0_15 = arith.constant 0 : index
    %c0_16 = arith.constant 0 : index
    %17 = vector.load %arg7[%c0_15, %c0_16] : memref<1x1xf32, #tpu.memory_space<vmem>>, vector<1x1xf32>
    %18 = vector.broadcast %17 : vector<1x1xf32> to vector<1x128xf32>
    %19 = arith.addf %16, %18 : vector<1x128xf32>
    %20 = arith.negf %19 : vector<1x128xf32>
    %21 = math.exp %20 : vector<1x128xf32>
    %cst_17 = arith.constant 1.000000e+00 : f32
    %22 = vector.broadcast %cst_17 : f32 to vector<1x128xf32>
    %23 = arith.addf %22, %21 : vector<1x128xf32>
    %24 = arith.divf %22, %23 : vector<1x128xf32>
    %25 = tpu.iota {dimensions = array<i32: 0>} : vector<2x128xi32>
    %c1_i32 = arith.constant 1 : i32
    %26 = vector.broadcast %c1_i32 : i32 to vector<2x128xi32>
    %27 = arith.cmpi eq, %25, %26 : vector<2x128xi32>
    %cst_18 = arith.constant 1.000000e+00 : f32
    %28 = vector.broadcast %cst_18 : f32 to vector<1x128xf32>
    %29 = arith.subf %28, %24 : vector<1x128xf32>
    %30 = vector.shape_cast %24 : vector<1x128xf32> to vector<1x128xf32>
    %31 = vector.broadcast %30 : vector<1x128xf32> to vector<2x128xf32>
    %32 = vector.shape_cast %29 : vector<1x128xf32> to vector<1x128xf32>
    %33 = vector.broadcast %32 : vector<1x128xf32> to vector<2x128xf32>
    %34 = arith.select %27, %31, %33 : vector<2x128xi1>, vector<2x128xf32>
    %c0_19 = arith.constant 0 : index
    %c0_20 = arith.constant 0 : index
    %35 = vector.load %arg8[%c0_19, %c0_20] : memref<2x128xf32, #tpu.memory_space<vmem>>, vector<2x128xf32>
    tpu.vector_store %arg8[%c0_19, %c0_20], %34 {strides = array<i32>} : memref<2x128xf32, #tpu.memory_space<vmem>>, vector<2x128xf32>,
    return
  }
  func.func @transform_0(%arg0: i32) -> (i32, i32) {
    %c0_i32 = arith.constant 0 : i32
    %c0_i32_0 = arith.constant 0 : i32
    return %c0_i32, %arg0 : i32, i32
  }
  func.func @transform_1(%arg0: i32) -> (i32, i32) {
    %c0_i32 = arith.constant 0 : i32
    %c0_i32_0 = arith.constant 0 : i32
    %c0_i32_1 = arith.constant 0 : i32
    return %c0_i32, %c0_i32_0 : i32, i32
  }
  func.func @transform_2(%arg0: i32) -> (i32, i32) {
    %c0_i32 = arith.constant 0 : i32
    %c0_i32_0 = arith.constant 0 : i32
    %c0_i32_1 = arith.constant 0 : i32
    return %c0_i32, %c0_i32_0 : i32, i32
  }
  func.func @transform_3(%arg0: i32) -> (i32, i32) {
    %c0_i32 = arith.constant 0 : i32
    %c0_i32_0 = arith.constant 0 : i32
    %c0_i32_1 = arith.constant 0 : i32
    return %c0_i32, %c0_i32_0 : i32, i32
  }
  func.func @transform_4(%arg0: i32) -> (i32, i32) {
    %c0_i32 = arith.constant 0 : i32
    %c0_i32_0 = arith.constant 0 : i32
    %c0_i32_1 = arith.constant 0 : i32
    return %c0_i32, %c0_i32_0 : i32, i32
  }
  func.func @transform_5(%arg0: i32) -> (i32, i32) {
    %c0_i32 = arith.constant 0 : i32
    %c0_i32_0 = arith.constant 0 : i32
    %c0_i32_1 = arith.constant 0 : i32
    return %c0_i32, %c0_i32_0 : i32, i32
  }
  func.func @transform_6(%arg0: i32) -> (i32, i32) {
    %c0_i32 = arith.constant 0 : i32
    %c0_i32_0 = arith.constant 0 : i32
    %c0_i32_1 = arith.constant 0 : i32
    return %c0_i32, %c0_i32_0 : i32, i32
  }
  func.func @transform_7(%arg0: i32) -> (i32, i32) {
    %c0_i32 = arith.constant 0 : i32
    %c0_i32_0 = arith.constant 0 : i32
    return %c0_i32, %arg0 : i32, i32
  }
}

</mosaic_0001>

<bundles_post_ra>
// kernel: tpu_custom_call.1
= control target key start
LH: loop header
LB: loop body
LE: loop exit
PB: predicated region body
PF: predicated region fallthrough
CT: control target
= control target key end

     0   :  { %s438_s0 = inlined_call_operand.vmem [shape: f32[29,128], index: 0, kind: input, shape index: {}]   ;;  %s439_s1 = inlined_call_operand.hbm [shape: f32[10,29], index: 1, kind: input, shape index: {}]   ;;  %s440_s2 = inlined_call_operand.vmem [shape: f32[10,1], index: 2, kind: input, shape index: {}]   ;;  %s441_s3 = inlined_call_operand.hbm [shape: f32[10,10], index: 3, kind: input, shape index: {}]   ;;  %s442_s4 = inlined_call_operand.vmem [shape: f32[10,1], index: 4, kind: input, shape index: {}]   ;;  %s443_s5 = inlined_call_operand.vmem [shape: f32[1,10], index: 5, kind: input, shape index: {}]   ;;  %s444_s6 = inlined_call_operand.<no memory space> [shape: f32[1,1], index: 6, kind: input, shape index: {}]   ;;  %s445_s7 = inlined_call_operand.hbm [shape: f32[2,128], index: 7, kind: output, shape index: {}]  }
   0x1   :  { %v12_v0 = vstv %s444_s6 }
   0x2   :  { %13 = vst [vmem:[#allocation2] sm:$0x1] %v12_v0 }
   0x3   :  { %14 = vsyncpa [#allocation4], 0 }
   0x4   :  { %15 = vsyncpa [#allocation7], 0 }
   0x5   :  { %16 = vsyncpa [#allocation5], 0  ;;  %s23_s28 = sshll.u32 %s439_s1, 4  ;;  %s348_s29 = smov [#allocation3]   ;;  %s24_s28 = int_to_ptr.hbm [resolvable:$true] %s23_s28 }
   0x6   :  { %s25_s30 = sshll.u32 %s348_s29, 4  ;;  %s38_s10 = sshll.u32 %s441_s3, 4  ;;  %s26_s30 = int_to_ptr.vmem [resolvable:$true] %s25_s30  ;;  %s39_s10 = int_to_ptr.hbm [resolvable:$true] %s38_s10 }
   0x7   :  { %s349_s11 = smov 128   ;;  %s350_s12 = smov 8  }
   0x8   :  { %31 = dma.hbm_to_vmem [thread:$0]  %s24_s28, 256, %s26_s30, [#allocation4], %s349_s11, %s349_s11, %s350_s12  }
   0x9   :  { %s351_s6 = smov [#allocation6]  }
   0xa   :  { %s40_s13 = sshll.u32 %s351_s6, 4  ;;  %s41_s13 = int_to_ptr.vmem [resolvable:$true] %s40_s13 }
   0xb   :  { %46 = dma.hbm_to_vmem [thread:$0]  %s39_s10, 256, %s41_s13, [#allocation7], %s349_s11, %s349_s11, %s350_s12  }
   0xc   :  { %342 = dma.done.wait [#allocation4], 256  }
   0xd   :  { %343 = vsyncadd [#allocation4], 4294967040 }
   0xe   :  { %344 = dma.done.wait [#allocation7], 256  }
   0xf   :  { %345 = vsyncadd [#allocation7], 4294967040  ;;  %v352_v1 = vmov 0   ;;  %vm86_vm0 = vcmask 1044480   ;;  %v64_v2 = vld [vmem:[%s438_s0 + $0x18] sm:$0x1f]  ;;  %v218_v43 = vlaneseq }
  0x10   :  { %263 = vset.pattern.permute.xlu0 %v352_v1  ;;  %264 = vset.pattern.permute.xlu1 %v352_v1  ;;  %v63_v3 = vld [vmem:[%s438_s0 + $0x10] sm:$0xff]  ;;  %v62_v4 = vld [vmem:[%s438_s0 + $0x8] sm:$0xff]  ;;  %v61_v6 = vld [vmem:[%s438_s0] sm:$0xff]  ;;  %vm79_vm1 = vcmask 236544   ;;  %vm136_vm2 = vcmask 1041408   ;;  %vm129_vm3 = vcmask 80896  }
  0x11   :  { %265 = vset.pattern.permute.xlu2 %v352_v1  ;;  %244 = vmatpush.msk.msra.mxu0 %vm86_vm0, %v64_v2  ;;  %v68_v5 = vld [vmem:[%s440_s2 + $0x8] sm:$0x3]  ;;  %v67_v9 = vld [vmem:[%s440_s2] sm:$0xff]  ;;  %v115_v20 = vld [vmem:[#allocation6] sm:$0xff]  ;;  %v219_v48 = vshrl.u32 %v218_v43, 7  ;;  %s233_s30 = sshll.u32 %s445_s7, 4  ;;  %s234_s30 = int_to_ptr.hbm [resolvable:$true] %s233_s30 }
  0x12   :  { %253 = vmatpush.msk.msra.mxu3 %vm86_vm0, %v64_v2  ;;  %76 = vperm.xlu0 %263, %v68_v5   ;;  %v65_v7 = vld [vmem:[#allocation3] sm:$0xff]  ;;  %v66_v8 = vld [vmem:[#allocation3 + $0x8] sm:$0x3]  ;;  %v116_v21 = vld [vmem:[#allocation6 + $0x8] sm:$0x3] }
  0x13   :  { %103 = vmatpush.msra.mxu0 %v63_v3  ;;  %v118_v10 = vld [vmem:[%s442_s4 + $0x8] sm:$0x3]  ;;  %v117_v11 = vld [vmem:[%s442_s4] sm:$0xff]  ;;  %vm220_vm8 = vcmp.eq.s32.totalorder %v219_v48, 1 }
  0x14   :  { %254 = vmatpush.msra.mxu3 %v63_v3  ;;  %126 = vperm.xlu1 %264, %v118_v10   ;;  %v166_v22 = vld [vmem:[#allocation2] sm:$0x1] }
  0x15   :  { %104 = vmatpush.msra.mxu0 %v62_v4  ;;  %169 = vperm.xlu2 %265, %v166_v22   ;;  %v165_v31 = vld [vmem:[%s443_s5] sm:$0x1]  ;;  %s353_s5 = smov [#allocation8]  }
  0x16   :  { %255 = vmatpush.msra.mxu3 %v62_v4  ;;  %s231_s27 = sshll.u32 %s353_s5, 4  ;;  %s232_s27 = int_to_ptr.vmem [resolvable:$true] %s231_s27 }
  0x17   :  { %105 = vmatpush.msra.mxu0 %v61_v6 }
  0x18   :  { %256 = vmatpush.msra.mxu3 %v61_v6  ;;  %245 = vmatmul.msk.f32.vlgmr.msra.gmra.mxu0 %vm79_vm1, %v65_v7 }
  0x19   :  { %246 = vmatmul.msk.f32.vlgmr.msra.gmra.mxu3 %vm79_vm1, %v66_v8 }
  0x1a   :  { %71 = vperm.xlu0 %263, %v67_v9  }
  0x1c   :  { %121 = vperm.xlu1 %264, %v117_v11  }
  0x6f   :  { %v170_v32 = vpop.permute.xlu2 %169 }
  0x70   :  { %v172_v33 = vperm.slane %v170_v32, 0 }
  0x84   :  { %v77_v12 = vpop.permute.xlu0 %76 }
  0x86   :  { %v127_v23 = vpop.permute.xlu1 %126 }
  0x8c   :  { %v72_v13 = vpop.permute.xlu0 %71 }
  0x8e   :  { %v122_v25 = vpop.permute.xlu1 %121 }
  0x95   :  { %v107_v14 = vpop.f32.mrf.mxu0 }
  0x96   :  { %v108_v16 = vadd.f32 %v107_v14, %v72_v13 }
  0x98   :  { %v113_v19 = vmax.f32 %v108_v16, 0.0 }
  0x9c   :  { %v110_v15 = vpop.f32.mrf.mxu3 }
  0x9d   :  { %v111_v17 = vadd.f32 %v110_v15, %v77_v12 }
  0x9f   :  { %v114_v18 = vmax.f32 %v111_v17, 0.0 }
  0xa1   :  { %247 = vmatpush.msk.msra.mxu1 %vm136_vm2, %v114_v18 }
  0xa3   :  { %155 = vmatpush.msra.mxu1 %v113_v19 }
  0xa4   :  { %248 = vmatmul.msk.f32.vlgmr.msra.gmra.mxu1 %vm129_vm3, %v115_v20 }
  0xac   :  { %249 = vmatmul.msk.f32.gmra.mxu1 %vm129_vm3, %v116_v21 }
 0x121   :  { %v157_v24 = vpop.f32.mrf.mxu1 }
 0x122   :  { %v158_v27 = vadd.f32 %v157_v24, %v122_v25 }
 0x124   :  { %v163_v30 = vmax.f32 %v158_v27, 0.0 }
 0x129   :  { %v160_v26 = vpop.f32.mrf.mxu1 }
 0x12a   :  { %v161_v28 = vadd.f32 %v160_v26, %v127_v23 }
 0x12c   :  { %v164_v29 = vmax.f32 %v161_v28, 0.0 }
 0x12e   :  { %250 = vmatpush.msk.msra.mxu2 %vm136_vm2, %v164_v29 }
 0x130   :  { %194 = vmatpush.msra.mxu2 %v163_v30 }
 0x131   :  { %251 = vmatmul.msk.f32.vlgmr.msra.gmra.mxu2 %vm129_vm3, %v165_v31 }
 0x1b4   :  { %v196_v34 = vpop.f32.mrf.mxu2 }
 0x1b5   :  { %v197_v35 = vadd.f32 %v196_v34, %v172_v33 }
 0x1b7   :  { %v252_v36 = vmul.f32 -1.442695, %v197_v35 }
 0x1b9   :  { %266 = vpow2.f32 %v252_v36 }
 0x1bf   :  { %v267_v37 = vpop.eup %266 }
 0x1c0   :  { %v202_v38 = vadd.f32 1.0, %v267_v37 }
 0x1c2   :  { %268 = vrcp.f32 %v202_v38  ;;  %v214_v42 = vand.u32 2147483648, %v202_v38  ;;  %v212_v45 = vand.u32 2147483647, %v202_v38  ;;  %vm208_vm5 = vweird.f32 %v202_v38 }
 0x1c4   :  { %v215_v47 = vor.u32 1.1754944e-38, %v214_v42  ;;  %vm213_vm7 = vcmp.eq.f32.partialorder %v212_v45, 8.507059e+37 }
 0x1c8   :  { %v269_v39 = vpop.eup %268 }
 0x1c9   :  { %v204_v40 = vmul.f32 %v269_v39, %v202_v38  ;;  %vm209_vm4 = vweird.f32 %v269_v39 }
 0x1ca   :  { %vm210_vm6 = vmor %vm208_vm5, %vm209_vm4 }
 0x1cb   :  { %v205_v41 = vsub.f32 1.0, %v204_v40 }
 0x1cd   :  { %v206_v44 = vmul.f32 %v269_v39, %v205_v41 }
 0x1cf   :  { %v207_v46 = vadd.f32 %v269_v39, %v206_v44 }
 0x1d1   :  { %v211_v49 = vsel %vm210_vm6, %v269_v39, %v207_v46 }
 0x1d2   :  { %v216_v50 = vsel %vm213_vm7, %v215_v47, %v211_v49 }
 0x1d3   :  { %v221_v51 = vsub.f32 1.0, %v216_v50  ;;  %v222_v52 = vperm.slane %v216_v50, 0 }
 0x1d5   :  { %v223_v53 = vperm.slane %v221_v51, 0 }
 0x1d7   :  { %v224_v54 = vsel %vm220_vm8, %v222_v52, %v223_v53 }
 0x1d8   :  { %225 = vst [vmem:[#allocation8] sm:$0x3] %v224_v54 }
 0x1d9   :  { %236 = dma.vmem_to_hbm [thread:$0]  %s232_s27, 32, %s234_s30, [#allocation5]  }
 0x1da   :  { %346 = dma.done.wait [#allocation5], 32  }
 0x1db   :  { %347 = vsyncadd [#allocation5], 4294967264 }
 0x1dc   :  { %241 = vsyncpa [#allocation4], 1 }
 0x1dd   :  { %242 = vsyncpa [#allocation7], 1 }
 0x1de   :  { %243 = vsyncpa [#allocation5], 1 }

</bundles_post_ra>
